<compile_context>
chip_gen: v7x
topology: tpu7x:2x2x1
jax: 0.10.0
libtpu: 0.0.40
codegen_flags: <defaults>
</compile_context>

<pallas_src>
import functools

import jax
import jax.numpy as jnp
from jax.experimental import pallas as pl
from jax.experimental.pallas import tpu as pltpu


_LANE = 128
_SUBLANE = 8


def _round_up(x, m):
    return ((x + m - 1) // m) * m


def _cdiv(a, b):
    return (a + b - 1) // b


def _default_vmem_limit_bytes():
    """3/4 of physical VMEM (v5e/v6e: ~96 MiB, v7x: ~48 MiB), capped."""
    cap = None
    try:
        info = pltpu.get_tpu_info()
        for attr in ("vmem_capacity_bytes", "vmem_size_bytes", "vmem_bytes"):
            cap = getattr(info, attr, None)
            if cap:
                break
    except Exception:
        cap = None
    if not cap:
        cap = 64 * 1024 * 1024          # conservative (v7x-sized) assumption
    return min((int(cap) * 3) // 4, 100 * 1024 * 1024)


def _lo_kernel(x_ref, w_ref, b_ref, out_ref, *, mode, mxu_dtype):
    """Fused Linear (+ log_softmax / softmax) for one (tm, K) row tile.

    x_ref:   (tm, K)  f32 tile of flattened hs_pad (cast to bf16 here)
    w_ref:   (K, N)   weight, grid-invariant (bf16 or f32)
    b_ref:   (1, N)   bias, f32
    out_ref: (tm, N)  requested output (logits / log-probs / probs)
    """
    x = x_ref[...]
    if mxu_dtype is not None:
        x = x.astype(mxu_dtype)        # in-kernel cast: free VPU op in VMEM
    logits = jnp.dot(x, w_ref[...], preferred_element_type=jnp.float32)
    logits = logits + b_ref[...]                      # (1, N) broadcast
    if mode == "logits":
        out_ref[...] = logits.astype(out_ref.dtype)
    else:
        # numerically-stable (log-)softmax over the (unpadded) vocab dim.
        m = jnp.max(logits, axis=-1, keepdims=True)
        shifted = logits - m
        e = jnp.exp(shifted)
        denom = jnp.sum(e, axis=-1, keepdims=True)
        if mode == "logp":
            out_ref[...] = (shifted - jnp.log(denom)).astype(out_ref.dtype)
        else:  # "probs"   (denom >= 1, approx reciprocal is safe & free on EUP)
            out_ref[...] = (e * pl.reciprocal(denom, approx=True)
                            ).astype(out_ref.dtype)


def k2mmi_lo(hs_pad, weight, bias, *, mode="logits", tm=2048, use_bf16=True,
             out_dtype=jnp.float32, vmem_limit_bytes=None):
    """Pallas implementation of K2MMI.lo (eval-mode Dropout = identity).

    hs_pad: (B, T, idim) float32
    weight: (idim, odim) float32   (torch Linear weight, transposed)
    bias:   (odim,)      float32
    mode:   "logits" -> x @ W + b
            "logp"   -> log_softmax(x @ W + b, axis=-1)
            "probs"  -> softmax(x @ W + b, axis=-1)
    returns (B, T, odim) in out_dtype (default float32, torch parity)
    """
    assert mode in ("logits", "logp", "probs")
    B, T, K = hs_pad.shape
    Kw, N = weight.shape
    assert Kw == K
    M = B * T

    if vmem_limit_bytes is None:
        vmem_limit_bytes = _default_vmem_limit_bytes()

    mxu_dtype = jnp.bfloat16 if use_bf16 else None
    w_bytes = 2 if use_bf16 else 4
    out_bytes = jnp.dtype(out_dtype).itemsize

    # Operand prep: NO activation cast, NO row padding, NO lane padding.
    x2d = hs_pad.reshape(M, K)                          # free metadata reshape
    w = weight.astype(jnp.bfloat16) if use_bf16 else weight   # tiny, one-time
    b2d = bias.astype(jnp.float32).reshape(1, N)

    # --- VMEM-need model (lane/sublane padded as Mosaic lays things out) ---
    lane_N = _round_up(N, _LANE)
    lane_K = _round_up(K, _LANE)
    n_tmp = 1 if mode == "logits" else 3                # f32 softmax temporaries

    def _vmem_need(t):
        return (2 * t * lane_K * 4                          # 2x f32 x tiles
                + 2 * _round_up(K, _SUBLANE) * lane_N * w_bytes   # 2x weight
                + 2 * _SUBLANE * lane_N * 4                  # 2x bias
                + 2 * t * lane_N * out_bytes                 # 2x out tiles
                + n_tmp * t * lane_N * 4)                    # temporaries

    budget = (vmem_limit_bytes * 3) // 4        # headroom for compiler scratch

    # --- choose row tile: cap by M, cap by VMEM, then balance + grid floor ---
    tm = max(_SUBLANE, min(_round_up(tm, _SUBLANE), _round_up(M, _SUBLANE)))
    while tm > _SUBLANE and _vmem_need(tm) > budget:
        tm = max(_SUBLANE, _round_up(tm // 2, _SUBLANE))

    # keep >=4 grid steps (when M allows) so megacore sharding and the
    # input/output double-buffer pipeline stay engaged.
    n_tiles = max(_cdiv(M, tm), min(4, _cdiv(M, _SUBLANE)))
    tm = _round_up(_cdiv(M, n_tiles), _SUBLANE)
    grid = (_cdiv(M, tm),)

    cost = pl.CostEstimate(
        flops=2 * M * K * N,
        transcendentals=0 if mode == "logits" else M * N,
        bytes_accessed=(M * K * 4 + K * N * w_bytes + N * 4
                        + M * N * out_bytes),
    )

    out = pl.pallas_call(
        functools.partial(_lo_kernel, mode=mode, mxu_dtype=mxu_dtype),
        out_shape=jax.ShapeDtypeStruct((M, N), out_dtype),
        grid_spec=pltpu.PrefetchScalarGridSpec(
            num_scalar_prefetch=0,
            grid=grid,
            in_specs=[
                pl.BlockSpec((tm, K), lambda i: (i, 0)),   # x row tile (f32)
                pl.BlockSpec((K, N), lambda i: (0, 0)),    # full weight
                pl.BlockSpec((1, N), lambda i: (0, 0)),    # bias
            ],
            out_specs=pl.BlockSpec((tm, N), lambda i: (i, 0)),
        ),
        compiler_params=pltpu.CompilerParams(
            dimension_semantics=("parallel",),
            vmem_limit_bytes=vmem_limit_bytes,
        ),
        cost_estimate=cost,
    )(x2d, w, b2d)

    return out.reshape(B, T, N)


class K2MMIPallas:
    """Deterministic, synthetic re-implementation of the dense part of K2MMI."""

    def __init__(self, idim, num_phones, dropout=0.1, den_scale=1.0,
                 eos_id=1, pad_id=-1, key=None):
        self.idim = idim
        self.odim = num_phones + 1          # len(phone_ids) + 1
        # TODO(synk): training-mode Dropout (stochastic mask via pltpu.prng_*)
        # omitted — eval-mode identity is used, matching torch .eval().
        self.dropout = dropout
        self.den_scale = den_scale
        self.eos_id = eos_id
        self.pad_id = pad_id

        key = jax.random.PRNGKey(0) if key is None else key
        kw, kb = jax.random.split(key)
        # torch.nn.Linear default init: U(-1/sqrt(idim), 1/sqrt(idim))
        bound = 1.0 / (idim ** 0.5)
        self.weight = jax.random.uniform(
            kw, (idim, self.odim), jnp.float32, -bound, bound)
        self.bias = jax.random.uniform(
            kb, (self.odim,), jnp.float32, -bound, bound)
        # lm_scores parameter (clone of bigram phone-LM arc scores, zero-init).
        n_arcs = (num_phones + 1) * (num_phones + 1)
        self.lm_scores = jnp.zeros((n_arcs,), jnp.float32)
        self.probs = None

    def lo(self, hs_pad):
        return k2mmi_lo(hs_pad, self.weight, self.bias, mode="logits")

    def log_softmax(self, hs_pad):
        return k2mmi_lo(hs_pad, self.weight, self.bias, mode="logp")

    def softmax(self, hs_pad):
        self.probs = k2mmi_lo(hs_pad, self.weight, self.bias, mode="probs")
        return self.probs

    def argmax(self, hs_pad):
        return jnp.argmax(self.lo(hs_pad), axis=2)

    def forward(self, hs_pad, hlens):
        # nnet_output = self.lo(hs_pad): the dense hot path, done in Pallas.
        nnet_output = self.lo(hs_pad)
        # TODO(synk): LFMMILoss / MmiTrainingGraphCompiler / k2 FSA intersection
        # are graph/lattice ops with no Pallas equivalent; nnet_output is what
        # would be fed to the k2 loss.
        return nnet_output


if __name__ == "__main__":
    key = jax.random.PRNGKey(0)
    B, T, idim, num_phones = 2, 8, 32, 48     # odim = 49

    module = K2MMIPallas(idim=idim, num_phones=num_phones, dropout=0.1,
                         den_scale=1.0, eos_id=1, pad_id=-1,
                         key=jax.random.PRNGKey(0))

    kx, _ = jax.random.split(key)
    hs_pad = jax.random.normal(kx, (B, T, idim), jnp.float32)
    hlens = jnp.array([T, T - 2], jnp.int32)

    logits = jax.block_until_ready(module.lo(hs_pad))
    logp = jax.block_until_ready(module.log_softmax(hs_pad))
    probs = jax.block_until_ready(module.softmax(hs_pad))
    _ = jax.block_until_ready(module.forward(hs_pad, hlens))
    _ = jax.block_until_ready(module.argmax(hs_pad))

    # Reference (bf16-cast inputs, exact f32 math) matching the default path.
    x_b = hs_pad.astype(jnp.bfloat16).astype(jnp.float32).reshape(-1, idim)
    w_b = module.weight.astype(jnp.bfloat16).astype(jnp.float32)
    ref_logits = (jnp.dot(x_b, w_b, precision=jax.lax.Precision.HIGHEST)
                  + module.bias).reshape(B, T, -1)
    ref_logp = jax.nn.log_softmax(ref_logits, axis=-1)
    ref_probs = jax.nn.softmax(ref_logits, axis=-1)

    assert logits.shape == (B, T, module.odim)
    assert logits.dtype == jnp.float32
    assert jnp.allclose(logits, ref_logits, atol=1e-4, rtol=1e-4)
    assert jnp.allclose(logp, ref_logp, atol=1e-4, rtol=1e-4)
    # probs uses the approximate (EUP) reciprocal -> slightly looser tolerance.
    assert jnp.allclose(probs, ref_probs, atol=5e-3, rtol=5e-3)

    # Exact-f32 path (use_bf16=False) for callers needing torch fp32 parity.
    logits_exact = jax.block_until_ready(
        k2mmi_lo(hs_pad, module.weight, module.bias, mode="logits",
                 use_bf16=False))
    ref_exact = (jnp.dot(hs_pad.reshape(-1, idim), module.weight,
                         precision=jax.lax.Precision.HIGHEST)
                 + module.bias).reshape(B, T, -1)
    assert jnp.allclose(logits_exact, ref_exact, atol=1e-4, rtol=1e-4)

    # Reduced-writeback (bf16 output) option runs and has the right shape.
    logp_bf16 = jax.block_until_ready(
        k2mmi_lo(hs_pad, module.weight, module.bias, mode="logp",
                 out_dtype=jnp.bfloat16))
    assert logp_bf16.shape == (B, T, module.odim)
    assert logp_bf16.dtype == jnp.bfloat16

    print("KERNEL_OK")
</pallas_src>

<mosaic_0001>
module attributes {stable_mosaic.version = 11 : i64} {
  func.func @_lo_kernel(%arg0: i32, %arg1: memref<8x32xf32, #tpu.memory_space<vmem>>, %arg2: memref<32x49xbf16, #tpu.memory_space<vmem>>, %arg3: memref<1x49xf32, #tpu.memory_space<vmem>>, %arg4: memref<8x49xf32, #tpu.memory_space<vmem>>) attributes {dimension_semantics = [#tpu.dimension_semantics<parallel>], iteration_bounds = array<i64: 2>, scalar_prefetch = 0 : i64, scratch_operands = 0 : i64, tpu.core_type = #tpu.core_type<tc>, window_params = [{transform_indices = @transform_0, window_bounds = array<i64: 8, 32>}, {pipeline_mode = #tpu.pipeline_mode<synchronous>, transform_indices = @transform_1, window_bounds = array<i64: 32, 49>}, {pipeline_mode = #tpu.pipeline_mode<synchronous>, transform_indices = @transform_2, window_bounds = array<i64: 1, 49>}, {transform_indices = @transform_3, window_bounds = array<i64: 8, 49>}]} {
    %c0 = arith.constant 0 : index
    %c0_0 = arith.constant 0 : index
    %0 = vector.load %arg1[%c0, %c0_0] : memref<8x32xf32, #tpu.memory_space<vmem>>, vector<8x32xf32>
    %1 = arith.truncf %0 : vector<8x32xf32> to vector<8x32xbf16>
    %c0_1 = arith.constant 0 : index
    %c0_2 = arith.constant 0 : index
    %2 = vector.load %arg2[%c0_1, %c0_2] : memref<32x49xbf16, #tpu.memory_space<vmem>>, vector<32x49xbf16>
    %cst = arith.constant dense<0.000000e+00> : vector<8x49xf32>
    %3 = tpu.matmul %1, %2, %cst {dimension_numbers = #tpu.dot_dimension_numbers<[1], [0], [0], [1], [0, 0, 1, 1], [], []>} : vector<8x32xbf16>, vector<32x49xbf16>, vector<8x49xf32> -> vector<8x49xf32>
    %c0_3 = arith.constant 0 : index
    %c0_4 = arith.constant 0 : index
    %4 = vector.load %arg3[%c0_3, %c0_4] : memref<1x49xf32, #tpu.memory_space<vmem>>, vector<1x49xf32>
    %5 = vector.broadcast %4 : vector<1x49xf32> to vector<8x49xf32>
    %6 = arith.addf %3, %5 : vector<8x49xf32>
    %c0_5 = arith.constant 0 : index
    %c0_6 = arith.constant 0 : index
    %7 = vector.load %arg4[%c0_5, %c0_6] : memref<8x49xf32, #tpu.memory_space<vmem>>, vector<8x49xf32>
    tpu.vector_store %arg4[%c0_5, %c0_6], %6 {strides = array<i32>} : memref<8x49xf32, #tpu.memory_space<vmem>>, vector<8x49xf32>,
    return
  }
  func.func @transform_0(%arg0: i32) -> (i32, i32) {
    %c0_i32 = arith.constant 0 : i32
    %c0_i32_0 = arith.constant 0 : i32
    return %arg0, %c0_i32 : i32, i32
  }
  func.func @transform_1(%arg0: i32) -> (i32, i32) {
    %c0_i32 = arith.constant 0 : i32
    %c0_i32_0 = arith.constant 0 : i32
    %c0_i32_1 = arith.constant 0 : i32
    return %c0_i32, %c0_i32_0 : i32, i32
  }
  func.func @transform_2(%arg0: i32) -> (i32, i32) {
    %c0_i32 = arith.constant 0 : i32
    %c0_i32_0 = arith.constant 0 : i32
    %c0_i32_1 = arith.constant 0 : i32
    return %c0_i32, %c0_i32_0 : i32, i32
  }
  func.func @transform_3(%arg0: i32) -> (i32, i32) {
    %c0_i32 = arith.constant 0 : i32
    %c0_i32_0 = arith.constant 0 : i32
    return %arg0, %c0_i32 : i32, i32
  }
}

</mosaic_0001>

<bundles_post_ra>
// kernel: tpu_custom_call.1
= control target key start
LH: loop header
LB: loop body
LE: loop exit
PB: predicated region body
PF: predicated region fallthrough
CT: control target
= control target key end

     0   :  { %8 = vsyncpa [#allocation3], 0  ;;  %s815_s0 = inlined_call_operand.hbm [shape: f32[16,32], index: 0, kind: input, shape index: {}]   ;;  %s816_s1 = inlined_call_operand.hbm [shape: bf16[32,49], index: 1, kind: input, shape index: {}]   ;;  %s817_s2 = inlined_call_operand.vmem [shape: f32[1,49], index: 2, kind: input, shape index: {}]   ;;  %s818_s3 = inlined_call_operand.hbm [shape: f32[16,49], index: 3, kind: output, shape index: {}]  }
   0x1   :  { %10 = vsyncpa [#allocation3 + $0x1], 0 }
   0x2   :  { %11 = vsyncpa [#allocation6], 0 }
   0x3   :  { %12 = vsyncpa [#allocation4], 0 }
   0x4   :  { %14 = vsyncpa [#allocation4 + $0x1], 0  ;;  %s616_s12 = smov 0   ;;  %s618_s13 = smov 0  }
   0x5   :  { %s620_s14 = smov 0   ;;  %s622_s15 = smov 0  }
   0x6 LB: > { %s637_s16 = sadd.s32 4294967295, %s587_s15   ;;  %s367_s17 = sadd.s32 4294967294, %s587_s15   ;;  %s587_s15 = sphi %s622_s15, %s838_s15   ;;  %s583_s14 = sphi %s620_s14, %s837_s14   ;;  %s579_s13 = sphi %s618_s13, %s836_s13   ;;  %s575_s12 = sphi %s616_s12, %s835_s12  }
   0x7   : > { %p40_p0 = scmp.ne.s32.totalorder %s579_s13, %s575_s12  ;;  %p819_p1 = scmp.eq.s32.totalorder %s637_s16, 0 }
   0x8   : > { %p112_p3 = scmp.eq.s32.totalorder %s367_s17, 1  ;;  %p368_p5 = scmp.ge.s32.totalorder %s587_s15, 1 }
   0x9   : > { %p646_p4 = por %p819_p1, %p40_p0  ;;  %p119_p7 = scmp.lt.s32.totalorder %s587_s15, 3 }
   0xa   : > { %p651_p6 = por %p112_p3, %p40_p0  ;;  %s589_s21 = smov [#allocation5]  }
   0xb   : > { %s822_s18 = scalar_select %p646_p4, 1, 0 }
   0xc   : > { %s823_s19 = scalar_select %p651_p6, 1, 0 }
   0xd   : > { %p656_p8 = pnand %p368_p5, %p119_p7  ;;  %s131_s22 = sshll.u32 %s589_s21, 4  ;;  %s660_s22 = int_to_ptr.vmem [resolvable:$true] %s131_s22 }
   0xe   : > { %s672_s24 = sadd.s32 1, %s587_s15   ;;  %s27_s25 = sadd.s32 1, %s583_s14 }
   0xf   : > { %s824_s20 = scalar_select %p656_p8, 1, 0 }
  0x10   : > { %p404_p9 = pneg %p656_p8  ;;  %s24_s26 = ssub.s32 %s587_s15, %s672_s24 }
  0x11   : > { %s459_s29 = scalar_lea.hbm %s816_s1, 256 }
  0x12   : > { %p667_p11 = pnand %p404_p9, %p819_p1  ;;  %p460_p12 = scmp.ne.s32.totalorder %s816_s1, %s459_s29 }
  0x13   : > { %p466_p5 = scmp.lt.u32.totalorder %s459_s29, %s816_s1 }
  0x14   : > { %p461_p13 = pneg %p667_p11 }
  0x16   : > { %p462_p0 = pnand %p461_p13, %p460_p12 }
  0x18   : > { %p463_p3 = pneg %p462_p0 }
  0x1a   : > { %p468_p7 = pnand %p466_p5, %p463_p3 }
  0x1c   : > { %471 = shalt.err (!%p468_p7)
}
  0x1d   : > { %s472_s7 = scalar_lea.vmem %s660_s22, 256  ;;  %p480_p2 = scmp.lt.s32.totalorder %s660_s22, %s660_s22 }
  0x1e   : > { %p473_p9 = scmp.ne.s32.totalorder %s660_s22, %s472_s7  ;;  %p481_p6 = scmp.lt.s32.totalorder %s472_s7, %s472_s7 }
  0x20   : > { %p475_p10 = pnand %p473_p9, %p461_p13  ;;  %p482_p4 = por %p481_p6, %p480_p2 }
  0x22   : > { %p476_p1 = pneg %p475_p10 }
  0x24   : > { %p483_p8 = pnand %p482_p4, %p476_p1 }
  0x26   : > { %486 = shalt.err (!%p483_p8)
}
  0x27   : > { %s590_s8 = smov 64   ;;  %s591_s9 = smov 4  }
  0x28   : > { %407 = dma.hbm_to_vmem [thread:$0]  (!%p667_p11), %s816_s1, 256, %s660_s22, [#allocation6], %s590_s8, %s590_s8, %s591_s9  }
  0x29   : > { %p25_p2 = scmp.eq.s32.totalorder %s24_s26, 0  ;;  %p34_p1 = scmp.ne.s32.totalorder %s583_s14, %s579_s13 }
  0x2a   : > { %p35_p4 = scmp.eq.s32.totalorder %s587_s15, 0  ;;  %p417_p6 = scmp.lt.s32.totalorder %s587_s15, 2 }
  0x2b   : > { %s703_s17 = scalar_select %p25_p2, %s583_s14, %s27_s25  }
  0x2c   : > { %p36_p8 = por %p35_p4, %p34_p1  ;;  %p826_p10 = scmp.eq.s32.totalorder %s637_s16, 1 }
  0x2d   : > { %s148_s27 = sand.u32 1, %s583_s14   ;;  %s372_s28 = sshll.u32 %s587_s15, 7 }
  0x2e   : > { %p707_p12 = por %p826_p10, %p34_p1  ;;  %s371_s29 = sshll.u32 %s148_s27, 3 }
  0x2f   : > { %s716_s4 = scalar_lea.hbm %s815_s0, %s372_s28  ;;  %s152_s22 = scalar_lea.vmem [#allocation2], %s371_s29 }
  0x30   : > { %s159_s25 = sshll.u32 %s152_s22, 4  ;;  %p718_p11 = pnand %p417_p6, %p36_p8  ;;  %s722_s25 = int_to_ptr.vmem [resolvable:$true] %s159_s25 }
  0x31   : > { %s149_s5 = scalar_lea.sflag [#allocation3], %s148_s27  ;;  %s487_s6 = scalar_lea.hbm %s716_s4, 128 }
  0x32   : > { %p488_p13 = scmp.ne.s32.totalorder %s716_s4, %s487_s6  ;;  %p489_p0 = pneg %p718_p11 }
  0x33   : > { %s492_s9 = scalar_lea.hbm %s815_s0, 256  ;;  %p493_p7 = scmp.lt.u32.totalorder %s716_s4, %s815_s0 }
  0x34   : > { %p490_p3 = pnand %p489_p0, %p488_p13  ;;  %p494_p9 = scmp.lt.u32.totalorder %s492_s9, %s487_s6 }
  0x35   : > { %p496_p1 = scmp.lt.u32.totalorder %s487_s6, %s716_s4 }
  0x36   : > { %p491_p5 = pneg %p490_p3  ;;  %p495_p2 = por %p494_p9, %p493_p7 }
  0x38   : > { %p497_p4 = por %p496_p1, %p495_p2 }
  0x3a   : > { %p498_p6 = pnand %p497_p4, %p491_p5 }
  0x3c   : > { %501 = shalt.err (!%p498_p6)
}
  0x3d   : > { %s502_s27 = scalar_lea.vmem %s722_s25, 128  ;;  %s592_s28 = smov [#allocation2]  }
  0x3e   : > { %p503_p8 = scmp.ne.s32.totalorder %s722_s25, %s502_s27  ;;  %s507_s29 = sshll.u32 %s592_s28, 4  ;;  %s508_s29 = int_to_ptr.vmem [resolvable:$false] %s507_s29 }
  0x3f   : > { %s509_s23 = scalar_lea.vmem %s508_s29, 256  ;;  %p510_p3 = scmp.lt.s32.totalorder %s722_s25, %s508_s29 }
  0x40   : > { %p505_p10 = pnand %p503_p8, %p489_p0  ;;  %p511_p7 = scmp.lt.s32.totalorder %s509_s23, %s502_s27 }
  0x42   : > { %p506_p13 = pneg %p505_p10  ;;  %p512_p9 = por %p511_p7, %p510_p3 }
  0x44   : > { %p513_p2 = pnand %p512_p9, %p506_p13 }
  0x46   : > { %516 = shalt.err (!%p513_p2)
}
  0x47   : > { %411 = dma.hbm_to_vmem [thread:$0]  (!%p718_p11), %s716_s4, 128, %s722_s25, %s149_s5  }
  0x48   : > { %p829_p5 = scmp.ne.s32.totalorder %s824_s20, 0 }
  0x49   : > { %s752_s30 = sand.u32 (!%p829_p5), 1, %s579_s13   ;;  %p830_p0 = scmp.ne.s32.totalorder (!%p829_p5), %s822_s18, 0 }
  0x4a   : > { %168 = sbr.rel (%p829_p5) target bundleno = 322 (0x142), region = 32  ;;  %s374_s22 = sshll.u32 (!%p829_p5), %s752_s30, 3 }
  0x4b   : > { %s171_s6 = scalar_lea.sflag (!%p829_p5), [#allocation3], %s752_s30  ;;  %s174_s7 = scalar_lea.vmem (!%p829_p5), [#allocation2], %s374_s22 }
  0x51   : > { %562 = dma.done.wait (%p830_p0), %s171_s6, 128  }
  0x52   : > { %564 = vsyncadd (%p830_p0), %s171_s6, 4294967168  ;;  %p831_p1 = scmp.eq.s32.totalorder %s637_s16, 0 }
  0x54   : > { %566 = dma.done.wait (%p831_p1), [#allocation6], 256   ;;  %p832_p11 = pmov %p831_p1 }
  0x55   : > { %v593_v0 = vmov 0.0   ;;  %vm594_vm0 = vmmov 0   ;;  %v457_v1 = vld [vmem:[#allocation5] sm:$0xff]   ;;  %v458_v2 = vld [vmem:[#allocation5 + $0x8] sm:$0xff]   ;;  %v202_v3 = vld [vmem:[%s174_s7] sm:$0xff]  ;;  %vm227_vm1 = vcmask 261120  }
  0x56   : > { %568 = vsyncadd (%p832_p11), [#allocation6], 4294967040  ;;  %388 = vmatprep.subr.bf16.mxu0 %v593_v0  ;;  %392 = vmatprep.mubr.msk.bf16.mxu0 %vm594_vm0, %v593_v0  ;;  %v203_v4 = vpack.c.bf16 %v202_v3, %v202_v3  ;;  %v377_v5 = vld [vmem:[%s817_s2] ss:$0 sm:$0xff]  ;;  %s382_s4 = sshll.u32 %s637_s16, 7  ;;  %s200_s25 = scalar_lea.vmem [#allocation7], %s374_s22 }
  0x57   : > { %389 = vmatpush3.bf16.msra.mxu0 %v457_v1  ;;  %s287_s26 = sshll.u32 %s200_s25, 4  ;;  %vm271_vm2 = vcmask 400384   ;;  %s771_s9 = scalar_lea.hbm %s818_s3, %s382_s4  ;;  %s773_s26 = int_to_ptr.vmem [resolvable:$true] %s287_s26 }
  0x58   : > { %390 = vmatprep.subr.bf16.mxu0 %v593_v0  ;;  %s274_s16 = scalar_lea.sflag [#allocation4], %s752_s30  ;;  %s517_s10 = scalar_lea.vmem %s773_s26, 128 }
  0x59   : > { %p518_p4 = scmp.ne.s32.totalorder %s773_s26, %s517_s10  ;;  %s595_s11 = smov [#allocation7]  }
  0x5a   : > { %s521_s27 = sshll.u32 %s595_s11, 4  ;;  %s522_s27 = int_to_ptr.vmem [resolvable:$false] %s521_s27 }
  0x5b   : > { %391 = vmatpush3.bf16.msra.mxu0 %v458_v2  ;;  %p519_p6 = pnand %p518_p4, %p707_p12  ;;  %s523_s28 = scalar_lea.vmem %s522_s27, 256 }
  0x5c   : > { %p524_p10 = scmp.lt.s32.totalorder %s773_s26, %s522_s27  ;;  %p525_p13 = scmp.lt.s32.totalorder %s523_s28, %s517_s10 }
  0x5d   : > { %p520_p8 = pneg %p519_p6 }
  0x5e   : > { %393 = vmatmul.mubr.msk.bf16.vlgmr.msra.gmra.mrb[0].mxu0 %vm227_vm1, %v203_v4  ;;  %p526_p3 = por %p525_p13, %p524_p10 }
  0x60   : > { %p527_p7 = pnand %p526_p3, %p520_p8 }
 0x131   : > { %v265_v6 = vpop.f32.mrb[0].mxu0 }
 0x132   : > { %v266_v7 = vadd.f32 %v377_v5, %v265_v6  ;;  %v394_v8 = vpop.f32.mrb[1].mxu0 }
 0x133   : > { %v268_v9 = vpop.f32.mrb[2].mxu0 }
 0x134   : > { %v395_v10 = vpop.f32.mrb[3].mxu0  ;;  %272 = vst.msk [vmem:[%s200_s25] sm:$0xff] %vm271_vm2, %v266_v7 }
 0x135   : > { %530 = shalt.err (!%p527_p7)
}
 0x136   : > { %s531_s29 = scalar_lea.hbm %s771_s9, 128  ;;  %s535_s22 = scalar_lea.hbm %s818_s3, 256 }
 0x137   : > { %p532_p9 = scmp.ne.s32.totalorder %s771_s9, %s531_s29  ;;  %p536_p0 = scmp.lt.u32.totalorder %s771_s9, %s818_s3 }
 0x138   : > { %p537_p1 = scmp.lt.u32.totalorder %s535_s22, %s531_s29  ;;  %p539_p4 = scmp.lt.u32.totalorder %s531_s29, %s771_s9 }
 0x139   : > { %p533_p2 = pnand %p532_p9, %p707_p12 }
 0x13a   : > { %p538_p11 = por %p537_p1, %p536_p0 }
 0x13b   : > { %p534_p5 = pneg %p533_p2 }
 0x13c   : > { %p540_p6 = por %p539_p4, %p538_p11 }
 0x13e   : > { %p541_p8 = pnand %p540_p6, %p534_p5 }
 0x140   : > { %544 = shalt.err (!%p541_p8)
}
 0x141   : > { %402 = dma.vmem_to_hbm [thread:$0]  (%p707_p12), %s773_s26, 128, %s771_s9, %s274_s16  }
 0x142 PF: > { %s299_s18 = sand.u32 1, %s575_s12   ;;  %p833_p10 = scmp.ne.s32.totalorder %s823_s19, 0 }
 0x143   : > { %p834_p13 = scmp.ge.s32.totalorder %s587_s15, 2  ;;  %s300_s20 = scalar_lea.sflag [#allocation4], %s299_s18 }
 0x145   : > { %p413_p3 = pnand %p834_p13, %p833_p10 }
 0x147   : > { %570 = dma.done.wait (!%p413_p3), %s300_s20, 128  }
 0x148   : > { %572 = vsyncadd (!%p413_p3), %s300_s20, 4294967168  ;;  %p17_p7 = scmp.ge.s32.totalorder %s672_s24, 4   ;;  %s835_s12 = smov %s579_s13 }
 0x149   : > { %s836_s13 = smov %s583_s14  ;;  %s837_s14 = smov %s703_s17 }
 0x14a   : > { %s838_s15 = smov %s672_s24  ;;  %19 = sbr.rel (!%p17_p7) target bundleno = 6 (0x6), region = 81 }
 0x151   :  { %305 = vsyncpa [#allocation3], 1 }
 0x152   :  { %307 = vsyncpa [#allocation3 + $0x1], 1 }
 0x153   :  { %308 = vsyncpa [#allocation6], 1 }
 0x154   :  { %309 = vsyncpa [#allocation4], 1 }
 0x155   :  { %311 = vsyncpa [#allocation4 + $0x1], 1 }

</bundles_post_ra>
